<compile_context>
chip_gen: v7x
topology: tpu7x:2x2x1
jax: 0.10.0
libtpu: 0.0.40
codegen_flags: <defaults>
</compile_context>

<pallas_src>
import functools
import math

import jax
import jax.numpy as jnp
from jax import lax
from jax.experimental import pallas as pl
from jax.experimental.pallas import tpu as pltpu

EPS = 1e-5  # nn.LayerNorm default


def _round_up(x, m):
    return (x + m - 1) // m * m


def _prenorm_kernel(x_ref, g_ref, b_ref, w_ref, wb_ref, o_ref,
                    y_ref, acc_ref, *, inv_d, tk):
    """One (row-tile i, out-col tile j, K tile k) step of LayerNorm+Linear."""
    j = pl.program_id(1)          # output-column (N) tile
    k = pl.program_id(2)          # reduction (K) tile
    nk = pl.num_programs(2)

    # --- LayerNorm: once per row tile (first (j, k) visit).  Single pass
    #     (var = E[x^2] - mean^2) in f32; result stored in the weight's
    #     native dtype so the MXU runs its native path. ---
    @pl.when(jnp.logical_and(j == 0, k == 0))
    def _():
        x = x_ref[...].astype(jnp.float32)
        s = jnp.sum(x, axis=-1, keepdims=True)
        s2 = jnp.sum(x * x, axis=-1, keepdims=True)
        mean = s * inv_d
        var = s2 * inv_d - mean * mean
        inv = lax.rsqrt(var + EPS)
        y = (x - mean) * inv * g_ref[...].astype(jnp.float32) \
            + b_ref[...].astype(jnp.float32)
        y_ref[...] = y.astype(y_ref.dtype)

    # --- accumulator init on first K step ---
    @pl.when(k == 0)
    def _():
        acc_ref[...] = jnp.zeros_like(acc_ref)

    # --- MXU: k-th K-slice of the normalized rows x weight tile ---
    off = pl.multiple_of(k * tk, tk)
    yk = y_ref[:, pl.ds(off, tk)]
    acc_ref[...] += jnp.dot(yk, w_ref[...], preferred_element_type=jnp.float32)

    # --- finalize: add Linear bias once, cast, store ---
    @pl.when(k == nk - 1)
    def _():
        o_ref[...] = (acc_ref[...]
                      + wb_ref[...].astype(jnp.float32)).astype(o_ref.dtype)


@functools.partial(jax.jit, static_argnames=("tm", "tn", "tk"))
def prenorm(x, gamma, beta, w, wb, *, tm=256, tn=512, tk=512):
    """PreNorm forward: fn(LayerNorm(x)) with fn = Linear(D, D).

    x:     (B, N, D)
    gamma: (D,)   LayerNorm weight
    beta:  (D,)   LayerNorm bias
    w:     (D, D) Linear weight, laid out so the op is  y @ w
    wb:    (D,)   Linear bias
    """
    B, N, D = x.shape
    M = B * N

    # --- tile sizing: lane-dense, MXU-aligned, shape-padded ---
    assert tm % 8 == 0 and tn % 128 == 0 and tk % 128 == 0
    d128 = _round_up(D, 128)
    tn = min(tn, d128)
    tk = min(tk, d128)
    tm = min(tm, _round_up(M, 8))
    Dp = _round_up(D, tn * tk // math.gcd(tn, tk))   # multiple of tn, tk, 128
    Mp = _round_up(M, tm)
    # TODO(synk): for very large D (>~8K) raise vmem_limit_bytes in
    # CompilerParams; with these defaults the footprint stays under 32 MiB.

    # --- zero-pad everything (padding is inert for LayerNorm + Linear) ---
    x2 = jnp.pad(x.reshape(M, D), ((0, Mp - M), (0, Dp - D)))
    g2 = jnp.pad(gamma.reshape(1, D), ((0, 0), (0, Dp - D)))
    b2 = jnp.pad(beta.reshape(1, D), ((0, 0), (0, Dp - D)))
    w2 = jnp.pad(w, ((0, Dp - D), (0, Dp - D)))
    wb2 = jnp.pad(wb.reshape(1, D), ((0, 0), (0, Dp - D)))

    grid = (Mp // tm, Dp // tn, Dp // tk)
    kernel = functools.partial(_prenorm_kernel, inv_d=1.0 / D, tk=tk)

    out = pl.pallas_call(
        kernel,
        out_shape=jax.ShapeDtypeStruct((Mp, Dp), x.dtype),
        grid_spec=pltpu.PrefetchScalarGridSpec(
            num_scalar_prefetch=0,
            grid=grid,
            in_specs=[
                pl.BlockSpec((tm, Dp), lambda i, j, k: (i, 0)),   # x rows (full width, resident across j,k)
                pl.BlockSpec((1, Dp), lambda i, j, k: (0, 0)),    # gamma
                pl.BlockSpec((1, Dp), lambda i, j, k: (0, 0)),    # beta
                pl.BlockSpec((tk, tn), lambda i, j, k: (k, j)),   # weight tile
                pl.BlockSpec((1, tn), lambda i, j, k: (0, j)),    # linear bias tile
            ],
            out_specs=pl.BlockSpec((tm, tn), lambda i, j, k: (i, j)),
            scratch_shapes=[
                pltpu.VMEM((tm, Dp), w.dtype),       # normalized rows (native matmul dtype)
                pltpu.VMEM((tm, tn), jnp.float32),   # f32 matmul accumulator
            ],
        ),
        compiler_params=pltpu.CompilerParams(
            # rows shard across the 2 TCs on v7x; k is a reduction; j must
            # stay "arbitrary" so every core passes through j == 0 per row tile.
            dimension_semantics=("parallel", "arbitrary", "arbitrary")),
    )(x2, g2, b2, w2, wb2)

    return out[:M, :D].reshape(B, N, D)


def _reference(x, gamma, beta, w, wb):
    # Pure-JAX reference for PreNorm(LayerNorm -> Linear).
    xf = x.astype(jnp.float32)
    mean = jnp.mean(xf, axis=-1, keepdims=True)
    var = jnp.mean((xf - mean) ** 2, axis=-1, keepdims=True)
    y = (xf - mean) / jnp.sqrt(var + EPS) * gamma + beta
    return (y @ w.astype(jnp.float32) + wb).astype(x.dtype)


if __name__ == "__main__":
    B, N, D = 2, 8, 32  # batch, seq, hidden (dim)
    key = jax.random.PRNGKey(0)
    kx, kw, kb = jax.random.split(key, 3)

    x = jax.random.normal(kx, (B, N, D), dtype=jnp.float32)

    # LayerNorm params: torch default init weight=1, bias=0.
    gamma = jnp.ones((D,), dtype=jnp.float32)
    beta = jnp.zeros((D,), dtype=jnp.float32)

    # fn = Linear(D, D): deterministic synthetic weights.
    w = jax.random.normal(kw, (D, D), dtype=jnp.float32) * (1.0 / math.sqrt(D))
    wb = jax.random.normal(kb, (D,), dtype=jnp.float32) * 0.01

    out = prenorm(x, gamma, beta, w, wb)
    out = jax.block_until_ready(out)

    ref = _reference(x, gamma, beta, w, wb)
    assert out.shape == (B, N, D)
    assert jnp.allclose(out, ref, atol=1e-4, rtol=1e-4), "mismatch vs reference"

    print("KERNEL_OK")
</pallas_src>

<mosaic_0001>
module attributes {stable_mosaic.version = 11 : i64} {
  func.func @_prenorm_kernel(%arg0: i32, %arg1: i32, %arg2: i32, %arg3: memref<16x128xf32, #tpu.memory_space<vmem>>, %arg4: memref<1x128xf32, #tpu.memory_space<vmem>>, %arg5: memref<1x128xf32, #tpu.memory_space<vmem>>, %arg6: memref<128x128xf32, #tpu.memory_space<vmem>>, %arg7: memref<1x128xf32, #tpu.memory_space<vmem>>, %arg8: memref<16x128xf32, #tpu.memory_space<vmem>>, %arg9: memref<16x128xf32, #tpu.memory_space<vmem>>, %arg10: memref<16x128xf32, #tpu.memory_space<vmem>>) attributes {dimension_semantics = [#tpu.dimension_semantics<parallel>, #tpu.dimension_semantics<arbitrary>, #tpu.dimension_semantics<arbitrary>], iteration_bounds = array<i64: 1, 1, 1>, scalar_prefetch = 0 : i64, scratch_operands = 2 : i64, tpu.core_type = #tpu.core_type<tc>, window_params = [{transform_indices = @transform_0, window_bounds = array<i64: 16, 128>}, {pipeline_mode = #tpu.pipeline_mode<synchronous>, transform_indices = @transform_1, window_bounds = array<i64: 1, 128>}, {pipeline_mode = #tpu.pipeline_mode<synchronous>, transform_indices = @transform_2, window_bounds = array<i64: 1, 128>}, {transform_indices = @transform_3, window_bounds = array<i64: 128, 128>}, {transform_indices = @transform_4, window_bounds = array<i64: 1, 128>}, {transform_indices = @transform_5, window_bounds = array<i64: 16, 128>}]} {
    %c0_i32 = arith.constant 0 : i32
    %0 = arith.cmpi eq, %arg1, %c0_i32 : i32
    %c0_i32_0 = arith.constant 0 : i32
    %1 = arith.cmpi eq, %arg2, %c0_i32_0 : i32
    %2 = arith.andi %0, %1 : i1
    %3 = arith.extui %2 : i1 to i32
    %c0_i32_1 = arith.constant 0 : i32
    %4 = arith.cmpi ne, %3, %c0_i32_1 : i32
    scf.if %4 {
      %c0_12 = arith.constant 0 : index
      %c0_13 = arith.constant 0 : index
      %20 = vector.load %arg3[%c0_12, %c0_13] : memref<16x128xf32, #tpu.memory_space<vmem>>, vector<16x128xf32>
      %cst_14 = arith.constant dense<0.000000e+00> : vector<16xf32>
      %21 = vector.multi_reduction <add>, %20, %cst_14 [1] : vector<16x128xf32> to vector<16xf32>
      %22 = vector.shape_cast %21 : vector<16xf32> to vector<16x1xf32>
      %23 = arith.mulf %20, %20 : vector<16x128xf32>
      %cst_15 = arith.constant dense<0.000000e+00> : vector<16xf32>
      %24 = vector.multi_reduction <add>, %23, %cst_15 [1] : vector<16x128xf32> to vector<16xf32>
      %25 = vector.shape_cast %24 : vector<16xf32> to vector<16x1xf32>
      %cst_16 = arith.constant 3.125000e-02 : f32
      %26 = vector.broadcast %cst_16 : f32 to vector<16x1xf32>
      %27 = arith.mulf %22, %26 : vector<16x1xf32>
      %cst_17 = arith.constant 3.125000e-02 : f32
      %28 = vector.broadcast %cst_17 : f32 to vector<16x1xf32>
      %29 = arith.mulf %25, %28 : vector<16x1xf32>
      %30 = arith.mulf %27, %27 : vector<16x1xf32>
      %31 = arith.subf %29, %30 : vector<16x1xf32>
      %cst_18 = arith.constant 9.99999974E-6 : f32
      %32 = vector.broadcast %cst_18 : f32 to vector<16x1xf32>
      %33 = arith.addf %31, %32 : vector<16x1xf32>
      %34 = math.rsqrt %33 : vector<16x1xf32>
      %35 = vector.broadcast %27 : vector<16x1xf32> to vector<16x128xf32>
      %36 = arith.subf %20, %35 : vector<16x128xf32>
      %37 = vector.broadcast %34 : vector<16x1xf32> to vector<16x128xf32>
      %38 = arith.mulf %36, %37 : vector<16x128xf32>
      %c0_19 = arith.constant 0 : index
      %c0_20 = arith.constant 0 : index
      %39 = vector.load %arg4[%c0_19, %c0_20] : memref<1x128xf32, #tpu.memory_space<vmem>>, vector<1x128xf32>
      %40 = vector.broadcast %39 : vector<1x128xf32> to vector<16x128xf32>
      %41 = arith.mulf %38, %40 : vector<16x128xf32>
      %c0_21 = arith.constant 0 : index
      %c0_22 = arith.constant 0 : index
      %42 = vector.load %arg5[%c0_21, %c0_22] : memref<1x128xf32, #tpu.memory_space<vmem>>, vector<1x128xf32>
      %43 = vector.broadcast %42 : vector<1x128xf32> to vector<16x128xf32>
      %44 = arith.addf %41, %43 : vector<16x128xf32>
      %c0_23 = arith.constant 0 : index
      %c0_24 = arith.constant 0 : index
      %45 = vector.load %arg9[%c0_23, %c0_24] : memref<16x128xf32, #tpu.memory_space<vmem>>, vector<16x128xf32>
      tpu.vector_store %arg9[%c0_23, %c0_24], %44 {strides = array<i32>} : memref<16x128xf32, #tpu.memory_space<vmem>>, vector<16x128xf32>,
    } else {
    }
    %c0_i32_2 = arith.constant 0 : i32
    %5 = arith.cmpi eq, %arg2, %c0_i32_2 : i32
    %6 = arith.extui %5 : i1 to i32
    %c0_i32_3 = arith.constant 0 : i32
    %7 = arith.cmpi ne, %6, %c0_i32_3 : i32
    scf.if %7 {
      %cst_12 = arith.constant 0.000000e+00 : f32
      %20 = vector.broadcast %cst_12 : f32 to vector<16x128xf32>
      %c0_13 = arith.constant 0 : index
      %c0_14 = arith.constant 0 : index
      %21 = vector.load %arg10[%c0_13, %c0_14] : memref<16x128xf32, #tpu.memory_space<vmem>>, vector<16x128xf32>
      tpu.vector_store %arg10[%c0_13, %c0_14], %20 {strides = array<i32>} : memref<16x128xf32, #tpu.memory_space<vmem>>, vector<16x128xf32>,
    } else {
    }
    %c128_i32 = arith.constant 128 : i32
    %8 = arith.muli %arg2, %c128_i32 : i32
    %9 = tpu.assume_multiple %8, 128 : i32
    %c0 = arith.constant 0 : index
    %10 = arith.index_cast %9 : i32 to index
    %11 = vector.load %arg9[%c0, %10] : memref<16x128xf32, #tpu.memory_space<vmem>>, vector<16x128xf32>
    %c0_4 = arith.constant 0 : index
    %c0_5 = arith.constant 0 : index
    %12 = vector.load %arg10[%c0_4, %c0_5] : memref<16x128xf32, #tpu.memory_space<vmem>>, vector<16x128xf32>
    %c0_6 = arith.constant 0 : index
    %c0_7 = arith.constant 0 : index
    %13 = vector.load %arg6[%c0_6, %c0_7] : memref<128x128xf32, #tpu.memory_space<vmem>>, vector<128x128xf32>
    %cst = arith.constant dense<0.000000e+00> : vector<16x128xf32>
    %14 = tpu.matmul %11, %13, %cst {dimension_numbers = #tpu.dot_dimension_numbers<[1], [0], [0], [1], [0, 0, 1, 1], [], []>} : vector<16x128xf32>, vector<128x128xf32>, vector<16x128xf32> -> vector<16x128xf32>
    %15 = arith.addf %12, %14 : vector<16x128xf32>
    %c0_8 = arith.constant 0 : index
    %c0_9 = arith.constant 0 : index
    %16 = vector.load %arg10[%c0_8, %c0_9] : memref<16x128xf32, #tpu.memory_space<vmem>>, vector<16x128xf32>
    tpu.vector_store %arg10[%c0_8, %c0_9], %15 {strides = array<i32>} : memref<16x128xf32, #tpu.memory_space<vmem>>, vector<16x128xf32>,
    %c0_i32_10 = arith.constant 0 : i32
    %17 = arith.cmpi eq, %arg2, %c0_i32_10 : i32
    %18 = arith.extui %17 : i1 to i32
    %c0_i32_11 = arith.constant 0 : i32
    %19 = arith.cmpi ne, %18, %c0_i32_11 : i32
    scf.if %19 {
      %c0_12 = arith.constant 0 : index
      %c0_13 = arith.constant 0 : index
      %20 = vector.load %arg10[%c0_12, %c0_13] : memref<16x128xf32, #tpu.memory_space<vmem>>, vector<16x128xf32>
      %c0_14 = arith.constant 0 : index
      %c0_15 = arith.constant 0 : index
      %21 = vector.load %arg7[%c0_14, %c0_15] : memref<1x128xf32, #tpu.memory_space<vmem>>, vector<1x128xf32>
      %22 = vector.broadcast %21 : vector<1x128xf32> to vector<16x128xf32>
      %23 = arith.addf %20, %22 : vector<16x128xf32>
      %c0_16 = arith.constant 0 : index
      %c0_17 = arith.constant 0 : index
      %24 = vector.load %arg8[%c0_16, %c0_17] : memref<16x128xf32, #tpu.memory_space<vmem>>, vector<16x128xf32>
      tpu.vector_store %arg8[%c0_16, %c0_17], %23 {strides = array<i32>} : memref<16x128xf32, #tpu.memory_space<vmem>>, vector<16x128xf32>,
    } else {
    }
    return
  }
  func.func @transform_0(%arg0: i32, %arg1: i32, %arg2: i32) -> (i32, i32) {
    %c0_i32 = arith.constant 0 : i32
    %c0_i32_0 = arith.constant 0 : i32
    return %arg0, %c0_i32 : i32, i32
  }
  func.func @transform_1(%arg0: i32, %arg1: i32, %arg2: i32) -> (i32, i32) {
    %c0_i32 = arith.constant 0 : i32
    %c0_i32_0 = arith.constant 0 : i32
    %c0_i32_1 = arith.constant 0 : i32
    return %c0_i32, %c0_i32_0 : i32, i32
  }
  func.func @transform_2(%arg0: i32, %arg1: i32, %arg2: i32) -> (i32, i32) {
    %c0_i32 = arith.constant 0 : i32
    %c0_i32_0 = arith.constant 0 : i32
    %c0_i32_1 = arith.constant 0 : i32
    return %c0_i32, %c0_i32_0 : i32, i32
  }
  func.func @transform_3(%arg0: i32, %arg1: i32, %arg2: i32) -> (i32, i32) {
    %c0_i32 = arith.constant 0 : i32
    return %arg2, %arg1 : i32, i32
  }
  func.func @transform_4(%arg0: i32, %arg1: i32, %arg2: i32) -> (i32, i32) {
    %c0_i32 = arith.constant 0 : i32
    %c0_i32_0 = arith.constant 0 : i32
    return %c0_i32, %arg1 : i32, i32
  }
  func.func @transform_5(%arg0: i32, %arg1: i32, %arg2: i32) -> (i32, i32) {
    %c0_i32 = arith.constant 0 : i32
    return %arg0, %arg1 : i32, i32
  }
}

</mosaic_0001>

<bundles_post_ra>
// kernel: prenorm.1
= control target key start
LH: loop header
LB: loop body
LE: loop exit
PB: predicated region body
PF: predicated region fallthrough
CT: control target
= control target key end

     0   :  { %s406_s0 = inlined_call_operand.vmem [shape: f32[16,128], index: 0, kind: input, shape index: {}]   ;;  %s407_s3 = inlined_call_operand.vmem [shape: f32[128,128], index: 3, kind: input, shape index: {}]   ;;  %s408_s1 = inlined_call_operand.vmem [shape: f32[1,128], index: 1, kind: input, shape index: {}]   ;;  %s409_s2 = inlined_call_operand.vmem [shape: f32[1,128], index: 2, kind: input, shape index: {}]   ;;  %s410_s4 = inlined_call_operand.vmem [shape: f32[1,128], index: 4, kind: input, shape index: {}]   ;;  %s411_s5 = inlined_call_operand.vmem [shape: f32[16,128], index: 5, kind: output, shape index: {}]  }
   0x1   :  { %v328_v0 = vld [vmem:[%s406_s0] sm:$0xff]  ;;  %v333_v1 = vld [vmem:[%s406_s0 + $0x8] sm:$0xff]  ;;  %v89_v7 = vld [vmem:[%s407_s3 + $0x10] sm:$0xff] }
   0x2   :  { %v87_v2 = vld [vmem:[%s407_s3] sm:$0xff]  ;;  %28 = vadd.xlane.f32.xlu0 %v328_v0  ;;  %v32_v3 = vmul.f32 %v328_v0, %v328_v0  ;;  %v88_v4 = vld [vmem:[%s407_s3 + $0x8] sm:$0xff]  ;;  %v33_v6 = vmul.f32 %v333_v1, %v333_v1  ;;  %v90_v8 = vld [vmem:[%s407_s3 + $0x18] sm:$0xff] }
   0x3   :  { %v259_v5 = vpack.c.bf16 %v88_v4, %v87_v2  ;;  %v263_v9 = vpack.c.bf16 %v90_v8, %v89_v7  ;;  %v91_v10 = vld [vmem:[%s407_s3 + $0x20] sm:$0xff]  ;;  %v92_v11 = vld [vmem:[%s407_s3 + $0x28] sm:$0xff]  ;;  %v93_v13 = vld [vmem:[%s407_s3 + $0x30] sm:$0xff] }
   0x4   :  { %34 = vadd.xlane.f32.xlu1 %v32_v3  ;;  %v267_v12 = vpack.c.bf16 %v92_v11, %v91_v10  ;;  %v94_v14 = vld [vmem:[%s407_s3 + $0x38] sm:$0xff]  ;;  %v95_v16 = vld [vmem:[%s407_s3 + $0x40] sm:$0xff]  ;;  %v96_v17 = vld [vmem:[%s407_s3 + $0x48] sm:$0xff] }
   0x5   :  { %260 = vmatprep.subr.bf16.mxu0 %v259_v5  ;;  %v271_v15 = vpack.c.bf16 %v94_v14, %v93_v13  ;;  %v275_v18 = vpack.c.bf16 %v96_v17, %v95_v16  ;;  %v97_v19 = vld [vmem:[%s407_s3 + $0x50] sm:$0xff]  ;;  %v98_v20 = vld [vmem:[%s407_s3 + $0x58] sm:$0xff]  ;;  %v99_v21 = vld [vmem:[%s407_s3 + $0x60] sm:$0xff] }
   0x6   :  { %30 = vadd.xlane.f32.xlu0 %v333_v1  ;;  %262 = vmatpush3.bf16.msra.mxu0 %v259_v5  ;;  %v279_v22 = vpack.c.bf16 %v98_v20, %v97_v19  ;;  %v100_v23 = vld [vmem:[%s407_s3 + $0x68] sm:$0xff]  ;;  %v101_v25 = vld [vmem:[%s407_s3 + $0x70] sm:$0xff]  ;;  %v102_v26 = vld [vmem:[%s407_s3 + $0x78] sm:$0xff] }
   0x7   :  { %264 = vmatprep.subr.bf16.mxu0 %v263_v9  ;;  %v283_v24 = vpack.c.bf16 %v100_v23, %v99_v21  ;;  %v287_v27 = vpack.c.bf16 %v102_v26, %v101_v25  ;;  %v203_v44 = vld [vmem:[%s408_s1] ss:$0 sm:$0xff] }
   0x8   :  { %36 = vadd.xlane.f32.xlu1 %v33_v6  ;;  %v204_v46 = vld [vmem:[%s409_s2] ss:$0 sm:$0xff] }
   0x9   :  { %v205_v54 = vld [vmem:[%s410_s4] ss:$0 sm:$0xff] }
   0xa   :  { %266 = vmatpush3.bf16.msra.mxu0 %v263_v9 }
   0xb   :  { %268 = vmatprep.subr.bf16.mxu0 %v267_v12 }
   0xe   :  { %270 = vmatpush3.bf16.msra.mxu0 %v267_v12 }
   0xf   :  { %272 = vmatprep.subr.bf16.mxu0 %v271_v15 }
  0x12   :  { %274 = vmatpush3.bf16.msra.mxu0 %v271_v15 }
  0x13   :  { %276 = vmatprep.subr.bf16.mxu0 %v275_v18 }
  0x16   :  { %278 = vmatpush3.bf16.msra.mxu0 %v275_v18 }
  0x17   :  { %280 = vmatprep.subr.bf16.mxu0 %v279_v22 }
  0x1a   :  { %282 = vmatpush3.bf16.msra.mxu0 %v279_v22 }
  0x1b   :  { %284 = vmatprep.subr.bf16.mxu0 %v283_v24 }
  0x1e   :  { %286 = vmatpush3.bf16.msra.mxu0 %v283_v24 }
  0x1f   :  { %288 = vmatprep.subr.bf16.mxu0 %v287_v27 }
  0x22   :  { %290 = vmatpush3.bf16.msra.mxu0 %v287_v27 }
  0x8f   :  { %v29_v28 = vpop.xlane.xlu0 %28 }
  0x90   :  { %v38_v29 = vmul.f32 0.03125, %v29_v28 }
  0x91   :  { %v35_v30 = vpop.xlane.xlu1 %34 }
  0x92   :  { %v42_v31 = vmul.f32 %v38_v29, %v38_v29  ;;  %v40_v32 = vmul.f32 0.03125, %v35_v30  ;;  %v50_v42 = vsub.f32 %v328_v0, %v38_v29 }
  0x93   :  { %v31_v33 = vpop.xlane.xlu0 %30 }
  0x94   :  { %v44_v34 = vsub.f32 %v40_v32, %v42_v31  ;;  %v39_v35 = vmul.f32 0.03125, %v31_v33 }
  0x95   :  { %v37_v36 = vpop.xlane.xlu1 %36 }
  0x96   :  { %v46_v37 = vadd.f32 1e-05, %v44_v34  ;;  %v43_v38 = vmul.f32 %v39_v35, %v39_v35  ;;  %v41_v39 = vmul.f32 0.03125, %v37_v36  ;;  %v51_v47 = vsub.f32 %v333_v1, %v39_v35 }
  0x98   :  { %291 = vrsqrt.f32 %v46_v37  ;;  %v45_v40 = vsub.f32 %v41_v39, %v43_v38 }
  0x9a   :  { %v47_v41 = vadd.f32 1e-05, %v45_v40 }
  0x9c   :  { %293 = vrsqrt.f32 %v47_v41 }
  0xa2   :  { %v292_v43 = vpop.eup %291 }
  0xa3   :  { %v52_v45 = vmul.f32 %v292_v43, %v50_v42 }
  0xa5   :  { %v61_v48 = vmul.f32 %v203_v44, %v52_v45 }
  0xa6   :  { %v294_v49 = vpop.eup %293 }
  0xa7   :  { %v53_v50 = vmul.f32 %v294_v49, %v51_v47  ;;  %v70_v51 = vadd.f32 %v204_v46, %v61_v48 }
  0xa9   :  { %v62_v52 = vmul.f32 %v203_v44, %v53_v50  ;;  %256 = vmatprep.mubr.f32.mxu0 %v70_v51 }
  0xab   :  { %v71_v53 = vadd.f32 %v204_v46, %v62_v52 }
  0xad   :  { %257 = vmatmul.mubr.f32.vlgmr.msra.gmra.mrb[0].mxu0 %v71_v53 }
 0x180   :  { %v258_v55 = vpop.f32.mrb[0].mxu0 }
 0x181   :  { %v195_v56 = vadd.f32 %v258_v55, %v205_v54  ;;  %v169_v57 = vpop.f32.mrb[1].mxu0 }
 0x182   :  { %v194_v58 = vadd.f32 %v205_v54, %v169_v57 }
 0x183   :  { %197 = vst [vmem:[%s411_s5 + $0x8] sm:$0xff] %v195_v56 }
 0x184   :  { %196 = vst [vmem:[%s411_s5] sm:$0xff] %v194_v58 }

</bundles_post_ra>
